<compile_context>
chip_gen: v5e
topology: v5e:2x2
jax: 0.10.0
libtpu: 0.0.40
codegen_flags: <defaults>
</compile_context>

<pallas_src>
import functools

import jax
import jax.numpy as jnp
from jax.experimental import pallas as pl
from jax.experimental.pallas import tpu as pltpu


def detr_loss_kernel(eos_coef, logits_ref, boxes_ref, tcls_ref, tbox_ref,
                     mask_ref, out_ref):
    # Per grid step (TB batch elements, all Q queries):
    #   logits_ref: [TB, Q, C1]   boxes_ref/tbox_ref: [TB, 8, Q]
    #   tcls_ref:   [TB, Q, 1]    mask_ref: [TB, 1, Q]   out_ref: [TB, 1, 128]
    logits = logits_ref[...].astype(jnp.float32)
    C1 = logits.shape[-1]
    tgt = tcls_ref[...]                                      # [TB, Q, 1] int32

    cls_iota = jax.lax.broadcasted_iota(jnp.int32, (1, 1, C1), 2)

    # Cardinality folded into the max: m_real = max over real classes; the
    # no-object logit comes from a masked single-lane load (no extra reduce);
    # m = maximum(m_real, noobj) is the full row max used by the LSE; and
    # hit = (m_real >= noobj) reproduces torch.argmax's first-index tie-break
    # (no-object is the last class).
    m_real = jnp.max(jnp.where(cls_iota < C1 - 1, logits, -jnp.inf),
                     axis=-1, keepdims=True)                 # [TB, Q, 1]
    noobj = logits_ref[:, :, pl.ds(C1 - 1, 1)].astype(jnp.float32)
    m = jnp.maximum(m_real, noobj)
    lse = m + jnp.log(jnp.sum(jnp.exp(logits - m), axis=-1, keepdims=True))

    # Logit at the target class; no f32 one-hot cube is materialized.
    picked = jnp.sum(jnp.where(cls_iota == tgt, logits, 0.0),
                     axis=-1, keepdims=True)                 # [TB, Q, 1]

    # empty_weight is ones with eos_coef at the no-object (last) class.
    wt = jnp.where(tgt == C1 - 1, jnp.float32(eos_coef), jnp.float32(1.0))

    hit = (m_real >= noobj).astype(jnp.float32)              # [TB, Q, 1]

    # Per-batch partial sums (reduce over queries, keep the batch axis).
    ce_num = jnp.sum(wt * (lse - picked), axis=1, keepdims=True)   # [TB,1,1]
    ce_den = jnp.sum(wt, axis=1, keepdims=True)
    card = jnp.sum(hit, axis=1, keepdims=True)

    # L1 over matched boxes: coords on sublanes, queries lane-dense; the
    # [TB, 1, Q] mask broadcasts over the 8 coord sublanes for free.
    pb = boxes_ref[...].astype(jnp.float32)
    tb = tbox_ref[...].astype(jnp.float32)
    mask = mask_ref[...].astype(jnp.float32)
    l1 = jnp.sum(jnp.sum(jnp.abs(pb - tb) * mask, axis=2, keepdims=True),
                 axis=1, keepdims=True)                      # [TB,1,1]

    lane = jax.lax.broadcasted_iota(jnp.int32, (1, 1, 128), 2)
    out_ref[...] = jnp.where(lane == 0, ce_num,
                   jnp.where(lane == 1, ce_den,
                   jnp.where(lane == 2, l1,
                   jnp.where(lane == 3, card, 0.0))))


def _pick_batch_tile(B, per_batch_stream_bytes, per_batch_work_bytes,
                     vmem_budget_bytes=12 * 1024 * 1024):
    """Largest TB dividing B that (a) leaves >= 2 grid steps whenever B >= 2
    (pipeline overlap + both TensorCores on v7x) and (b) keeps the
    double-buffered input streams plus the f32 working set under a budget safe
    for v5e's 16 MiB scoped-VMEM default (v6e/v7x have more headroom)."""
    best = 1
    for tb in range(1, B + 1):
        if B % tb:
            continue
        if B >= 2 and B // tb < 2:
            continue
        need = 2 * tb * per_batch_stream_bytes + tb * per_batch_work_bytes
        if need > vmem_budget_bytes:
            continue
        best = tb
    return best


def detr_loss_pallas(pred_logits, pred_boxes, target_classes, target_boxes_sc,
                     match_mask, tgt_lengths, num_boxes, *, eos_coef=0.1):
    B, Q, C1 = pred_logits.shape
    ncoord = pred_boxes.shape[-1]          # 8 polygon coords

    # Layout plumbing (outside the kernel):
    #  * boxes as [B, 8, Q]: coords on the sublane axis, queries lane-dense.
    #  * mask as [B, 1, Q]: broadcast over the coord sublanes in-kernel.
    #  * target classes as [B, Q, 1]: queries on the sublane axis, matching the
    #    logits tile so no in-kernel relayout is needed.
    boxes_t = jnp.transpose(pred_boxes, (0, 2, 1))
    tboxes_t = jnp.transpose(target_boxes_sc.astype(jnp.float32), (0, 2, 1))
    mask3d = match_mask.astype(jnp.float32).reshape(B, 1, Q)
    tcls3d = target_classes.astype(jnp.int32).reshape(B, Q, 1)

    stream_bytes = (Q * C1 * pred_logits.dtype.itemsize
                    + Q * ncoord * (pred_boxes.dtype.itemsize + 4)
                    + Q * 4 + Q * 4)
    work_bytes = 6 * Q * C1 * 4            # f32 logits-shaped intermediates
    TB = _pick_batch_tile(B, stream_bytes, work_bytes)

    partials = pl.pallas_call(
        functools.partial(detr_loss_kernel, float(eos_coef)),
        out_shape=jax.ShapeDtypeStruct((B, 1, 128), jnp.float32),
        grid=(B // TB,),
        in_specs=[
            pl.BlockSpec((TB, Q, C1), lambda b: (b, 0, 0)),      # logits
            pl.BlockSpec((TB, ncoord, Q), lambda b: (b, 0, 0)),  # pred boxes
            pl.BlockSpec((TB, Q, 1), lambda b: (b, 0, 0)),       # target cls
            pl.BlockSpec((TB, ncoord, Q), lambda b: (b, 0, 0)),  # target boxes
            pl.BlockSpec((TB, 1, Q), lambda b: (b, 0, 0)),       # match mask
        ],
        out_specs=pl.BlockSpec((TB, 1, 128), lambda b: (b, 0, 0)),
        compiler_params=pltpu.CompilerParams(
            dimension_semantics=("parallel",)),
    )(pred_logits, boxes_t, tcls3d, tboxes_t, mask3d)

    # Tiny O(B) epilogue on the per-batch partial sums; num_boxes stays a
    # traced runtime value (no static baking -> no per-step recompiles) and is
    # clamped to >= 1 like DETR's torch.clamp(num_boxes, min=1).
    p = partials[:, 0, :4]                                    # [B, 4]
    num_boxes = jnp.maximum(jnp.asarray(num_boxes, jnp.float32), 1.0)
    tgt_len = jnp.asarray(tgt_lengths, jnp.float32).reshape(B)
    return {
        'loss_ce': p[:, 0].sum() / p[:, 1].sum(),
        'loss_bbox': p[:, 2].sum() / num_boxes,
        'cardinality_error': jnp.abs(p[:, 3] - tgt_len).mean(),
    }


if __name__ == "__main__":
    B, Q, NUM_CLASSES, T = 2, 8, 31, 4     # batch, queries, classes, targets/img
    C1 = NUM_CLASSES + 1
    eos_coef = 0.1

    key = jax.random.PRNGKey(0)
    k1, k2, k3, k4 = jax.random.split(key, 4)
    # f32 ingress in the self-test so the reference matches PyTorch f32
    # semantics; the kernel accepts bf16 equally (math is f32 inside).
    pred_logits = jax.random.normal(k1, (B, Q, C1), jnp.float32)
    pred_boxes = jax.random.uniform(k2, (B, Q, 8), jnp.float32)
    tgt_labels = jax.random.randint(k3, (B, T), 0, NUM_CLASSES)
    tgt_boxes = jax.random.uniform(k4, (B, T, 8), jnp.float32)

    # TODO(synk): Hungarian matcher (external `matcher` module) not reimplemented;
    # deterministic identity matching (query i <-> target i) is used as glue.
    src_idx = jnp.arange(T)
    tgt_idx = jnp.arange(T)

    # Glue: build dense, scattered targets from the (indices, targets) structures.
    target_classes = jnp.full((B, Q), NUM_CLASSES, jnp.int32)
    target_boxes_sc = jnp.zeros((B, Q, 8), jnp.float32)
    match_mask = jnp.zeros((B, Q), jnp.float32)
    for b in range(B):
        target_classes = target_classes.at[b, src_idx].set(
            tgt_labels[b, tgt_idx].astype(jnp.int32))
        target_boxes_sc = target_boxes_sc.at[b, src_idx].set(tgt_boxes[b, tgt_idx])
        match_mask = match_mask.at[b, src_idx].set(1.0)

    # num_boxes is a per-step, data-dependent (and normally all-reduced) value:
    # keep it as a traced array; the wrapper clamps it to >= 1.
    num_boxes = jnp.asarray(B * T, jnp.float32)
    tgt_lengths = jnp.full((B,), float(T), jnp.float32)

    losses = detr_loss_pallas(pred_logits, pred_boxes, target_classes,
                              target_boxes_sc, match_mask, tgt_lengths,
                              num_boxes, eos_coef=eos_coef)
    jax.block_until_ready(losses)

    # Pure-JAX reference check (same post-match math as the torch forward).
    logits_f32 = pred_logits.astype(jnp.float32)
    boxes_f32 = pred_boxes.astype(jnp.float32)
    empty_weight = jnp.ones((C1,), jnp.float32).at[-1].set(eos_coef)
    logp = jax.nn.log_softmax(logits_f32, -1)
    oh = jax.nn.one_hot(target_classes, C1, dtype=jnp.float32)
    wt = (empty_weight[None, None, :] * oh).sum(-1)
    ref_ce = (wt * -(logp * oh).sum(-1)).sum() / wt.sum()
    ref_bbox = (jnp.abs(boxes_f32 - target_boxes_sc)
                * match_mask[..., None]).sum() / jnp.maximum(num_boxes, 1.0)
    card_pred = (jnp.argmax(logits_f32, -1) != C1 - 1).sum(1).astype(jnp.float32)
    ref_card = jnp.abs(card_pred - tgt_lengths).mean()

    assert jnp.allclose(losses['loss_ce'], ref_ce, atol=1e-4, rtol=1e-4)
    assert jnp.allclose(losses['loss_bbox'], ref_bbox, atol=1e-4, rtol=1e-4)
    assert jnp.allclose(losses['cardinality_error'], ref_card, atol=1e-4, rtol=1e-4)
    print("KERNEL_OK")
</pallas_src>

<mosaic_0001>
module attributes {stable_mosaic.version = 11 : i64} {
  func.func @detr_loss_kernel(%arg0: i32, %arg1: memref<1x8x32xf32, #tpu.memory_space<vmem>>, %arg2: memref<1x8x8xf32, #tpu.memory_space<vmem>>, %arg3: memref<1x8x1xi32, #tpu.memory_space<vmem>>, %arg4: memref<1x8x8xf32, #tpu.memory_space<vmem>>, %arg5: memref<1x1x8xf32, #tpu.memory_space<vmem>>, %arg6: memref<1x1x128xf32, #tpu.memory_space<vmem>>) attributes {dimension_semantics = [#tpu.dimension_semantics<parallel>], iteration_bounds = array<i64: 2>, scalar_prefetch = 0 : i64, scratch_operands = 0 : i64, tpu.core_type = #tpu.core_type<tc>, window_params = [{transform_indices = @transform_0, window_bounds = array<i64: 1, 8, 32>}, {transform_indices = @transform_1, window_bounds = array<i64: 1, 8, 8>}, {transform_indices = @transform_2, window_bounds = array<i64: 1, 8, 1>}, {transform_indices = @transform_3, window_bounds = array<i64: 1, 8, 8>}, {transform_indices = @transform_4, window_bounds = array<i64: 1, 1, 8>}, {transform_indices = @transform_5, window_bounds = array<i64: 1, 1, 128>}]} {
    %c0 = arith.constant 0 : index
    %c0_0 = arith.constant 0 : index
    %c0_1 = arith.constant 0 : index
    %0 = vector.load %arg1[%c0, %c0_0, %c0_1] : memref<1x8x32xf32, #tpu.memory_space<vmem>>, vector<1x8x32xf32>
    %c0_2 = arith.constant 0 : index
    %c0_3 = arith.constant 0 : index
    %c0_4 = arith.constant 0 : index
    %1 = vector.load %arg3[%c0_2, %c0_3, %c0_4] : memref<1x8x1xi32, #tpu.memory_space<vmem>>, vector<1x8x1xi32>
    %2 = tpu.iota {dimensions = array<i32: 2>} : vector<1x1x32xi32>
    %c31_i32 = arith.constant 31 : i32
    %3 = vector.broadcast %c31_i32 : i32 to vector<1x1x32xi32>
    %4 = arith.cmpi slt, %2, %3 : vector<1x1x32xi32>
    %cst = arith.constant 0xFF800000 : f32
    %5 = vector.shape_cast %4 : vector<1x1x32xi1> to vector<1x1x32xi1>
    %6 = vector.broadcast %5 : vector<1x1x32xi1> to vector<1x8x32xi1>
    %7 = vector.broadcast %cst : f32 to vector<1x8x32xf32>
    %8 = arith.select %6, %0, %7 : vector<1x8x32xi1>, vector<1x8x32xf32>
    %cst_5 = arith.constant dense<0xFF800000> : vector<1x8xf32>
    %9 = vector.multi_reduction <maximumf>, %8, %cst_5 [2] : vector<1x8x32xf32> to vector<1x8xf32>
    %10 = vector.shape_cast %9 : vector<1x8xf32> to vector<1x8x1xf32>
    %c0_6 = arith.constant 0 : index
    %c0_7 = arith.constant 0 : index
    %c31 = arith.constant 31 : index
    %11 = vector.load %arg1[%c0_6, %c0_7, %c31] : memref<1x8x32xf32, #tpu.memory_space<vmem>>, vector<1x8x1xf32>
    %12 = arith.maximumf %10, %11 : vector<1x8x1xf32>
    %13 = vector.broadcast %12 : vector<1x8x1xf32> to vector<1x8x32xf32>
    %14 = arith.subf %0, %13 : vector<1x8x32xf32>
    %15 = math.exp %14 : vector<1x8x32xf32>
    %cst_8 = arith.constant dense<0.000000e+00> : vector<1x8xf32>
    %16 = vector.multi_reduction <add>, %15, %cst_8 [2] : vector<1x8x32xf32> to vector<1x8xf32>
    %17 = vector.shape_cast %16 : vector<1x8xf32> to vector<1x8x1xf32>
    %18 = math.log %17 : vector<1x8x1xf32>
    %19 = arith.addf %12, %18 : vector<1x8x1xf32>
    %20 = vector.broadcast %2 : vector<1x1x32xi32> to vector<1x8x32xi32>
    %21 = vector.broadcast %1 : vector<1x8x1xi32> to vector<1x8x32xi32>
    %22 = arith.cmpi eq, %20, %21 : vector<1x8x32xi32>
    %cst_9 = arith.constant 0.000000e+00 : f32
    %23 = vector.broadcast %cst_9 : f32 to vector<1x8x32xf32>
    %24 = arith.select %22, %0, %23 : vector<1x8x32xi1>, vector<1x8x32xf32>
    %cst_10 = arith.constant dense<0.000000e+00> : vector<1x8xf32>
    %25 = vector.multi_reduction <add>, %24, %cst_10 [2] : vector<1x8x32xf32> to vector<1x8xf32>
    %26 = vector.shape_cast %25 : vector<1x8xf32> to vector<1x8x1xf32>
    %c31_i32_11 = arith.constant 31 : i32
    %27 = vector.broadcast %c31_i32_11 : i32 to vector<1x8x1xi32>
    %28 = arith.cmpi eq, %1, %27 : vector<1x8x1xi32>
    %cst_12 = arith.constant 1.000000e-01 : f32
    %cst_13 = arith.constant 1.000000e+00 : f32
    %29 = vector.broadcast %cst_12 : f32 to vector<1x8x1xf32>
    %30 = vector.broadcast %cst_13 : f32 to vector<1x8x1xf32>
    %31 = arith.select %28, %29, %30 : vector<1x8x1xi1>, vector<1x8x1xf32>
    %32 = arith.cmpf oge, %10, %11 : vector<1x8x1xf32>
    %33 = arith.extui %32 : vector<1x8x1xi1> to vector<1x8x1xi32>
    %34 = arith.sitofp %33 : vector<1x8x1xi32> to vector<1x8x1xf32>
    %35 = arith.subf %19, %26 : vector<1x8x1xf32>
    %36 = arith.mulf %31, %35 : vector<1x8x1xf32>
    %cst_14 = arith.constant dense<0.000000e+00> : vector<1x1xf32>
    %37 = vector.multi_reduction <add>, %36, %cst_14 [1] : vector<1x8x1xf32> to vector<1x1xf32>
    %38 = vector.shape_cast %37 : vector<1x1xf32> to vector<1x1x1xf32>
    %cst_15 = arith.constant dense<0.000000e+00> : vector<1x1xf32>
    %39 = vector.multi_reduction <add>, %31, %cst_15 [1] : vector<1x8x1xf32> to vector<1x1xf32>
    %40 = vector.shape_cast %39 : vector<1x1xf32> to vector<1x1x1xf32>
    %cst_16 = arith.constant dense<0.000000e+00> : vector<1x1xf32>
    %41 = vector.multi_reduction <add>, %34, %cst_16 [1] : vector<1x8x1xf32> to vector<1x1xf32>
    %42 = vector.shape_cast %41 : vector<1x1xf32> to vector<1x1x1xf32>
    %c0_17 = arith.constant 0 : index
    %c0_18 = arith.constant 0 : index
    %c0_19 = arith.constant 0 : index
    %43 = vector.load %arg2[%c0_17, %c0_18, %c0_19] : memref<1x8x8xf32, #tpu.memory_space<vmem>>, vector<1x8x8xf32>
    %c0_20 = arith.constant 0 : index
    %c0_21 = arith.constant 0 : index
    %c0_22 = arith.constant 0 : index
    %44 = vector.load %arg4[%c0_20, %c0_21, %c0_22] : memref<1x8x8xf32, #tpu.memory_space<vmem>>, vector<1x8x8xf32>
    %c0_23 = arith.constant 0 : index
    %c0_24 = arith.constant 0 : index
    %c0_25 = arith.constant 0 : index
    %45 = vector.load %arg5[%c0_23, %c0_24, %c0_25] : memref<1x1x8xf32, #tpu.memory_space<vmem>>, vector<1x1x8xf32>
    %46 = arith.subf %43, %44 : vector<1x8x8xf32>
    %47 = math.absf %46 : vector<1x8x8xf32>
    %48 = vector.broadcast %45 : vector<1x1x8xf32> to vector<1x8x8xf32>
    %49 = arith.mulf %47, %48 : vector<1x8x8xf32>
    %cst_26 = arith.constant dense<0.000000e+00> : vector<1x8xf32>
    %50 = vector.multi_reduction <add>, %49, %cst_26 [2] : vector<1x8x8xf32> to vector<1x8xf32>
    %51 = vector.shape_cast %50 : vector<1x8xf32> to vector<1x8x1xf32>
    %cst_27 = arith.constant dense<0.000000e+00> : vector<1x1xf32>
    %52 = vector.multi_reduction <add>, %51, %cst_27 [1] : vector<1x8x1xf32> to vector<1x1xf32>
    %53 = vector.shape_cast %52 : vector<1x1xf32> to vector<1x1x1xf32>
    %54 = tpu.iota {dimensions = array<i32: 2>} : vector<1x1x128xi32>
    %c0_i32 = arith.constant 0 : i32
    %55 = vector.broadcast %c0_i32 : i32 to vector<1x1x128xi32>
    %56 = arith.cmpi eq, %54, %55 : vector<1x1x128xi32>
    %c1_i32 = arith.constant 1 : i32
    %57 = vector.broadcast %c1_i32 : i32 to vector<1x1x128xi32>
    %58 = arith.cmpi eq, %54, %57 : vector<1x1x128xi32>
    %c2_i32 = arith.constant 2 : i32
    %59 = vector.broadcast %c2_i32 : i32 to vector<1x1x128xi32>
    %60 = arith.cmpi eq, %54, %59 : vector<1x1x128xi32>
    %c3_i32 = arith.constant 3 : i32
    %61 = vector.broadcast %c3_i32 : i32 to vector<1x1x128xi32>
    %62 = arith.cmpi eq, %54, %61 : vector<1x1x128xi32>
    %cst_28 = arith.constant 0.000000e+00 : f32
    %63 = vector.shape_cast %42 : vector<1x1x1xf32> to vector<1x1x1xf32>
    %64 = vector.broadcast %63 : vector<1x1x1xf32> to vector<1x1x128xf32>
    %65 = vector.broadcast %cst_28 : f32 to vector<1x1x128xf32>
    %66 = arith.select %62, %64, %65 : vector<1x1x128xi1>, vector<1x1x128xf32>
    %67 = vector.shape_cast %53 : vector<1x1x1xf32> to vector<1x1x1xf32>
    %68 = vector.broadcast %67 : vector<1x1x1xf32> to vector<1x1x128xf32>
    %69 = arith.select %60, %68, %66 : vector<1x1x128xi1>, vector<1x1x128xf32>
    %70 = vector.shape_cast %40 : vector<1x1x1xf32> to vector<1x1x1xf32>
    %71 = vector.broadcast %70 : vector<1x1x1xf32> to vector<1x1x128xf32>
    %72 = arith.select %58, %71, %69 : vector<1x1x128xi1>, vector<1x1x128xf32>
    %73 = vector.shape_cast %38 : vector<1x1x1xf32> to vector<1x1x1xf32>
    %74 = vector.broadcast %73 : vector<1x1x1xf32> to vector<1x1x128xf32>
    %75 = arith.select %56, %74, %72 : vector<1x1x128xi1>, vector<1x1x128xf32>
    %c0_29 = arith.constant 0 : index
    %c0_30 = arith.constant 0 : index
    %c0_31 = arith.constant 0 : index
    %76 = vector.load %arg6[%c0_29, %c0_30, %c0_31] : memref<1x1x128xf32, #tpu.memory_space<vmem>>, vector<1x1x128xf32>
    tpu.vector_store %arg6[%c0_29, %c0_30, %c0_31], %75 {strides = array<i32>} : memref<1x1x128xf32, #tpu.memory_space<vmem>>, vector<1x1x128xf32>,
    return
  }
  func.func @transform_0(%arg0: i32) -> (i32, i32, i32) {
    %c0_i32 = arith.constant 0 : i32
    %c0_i32_0 = arith.constant 0 : i32
    %c0_i32_1 = arith.constant 0 : i32
    return %arg0, %c0_i32, %c0_i32_0 : i32, i32, i32
  }
  func.func @transform_1(%arg0: i32) -> (i32, i32, i32) {
    %c0_i32 = arith.constant 0 : i32
    %c0_i32_0 = arith.constant 0 : i32
    %c0_i32_1 = arith.constant 0 : i32
    return %arg0, %c0_i32, %c0_i32_0 : i32, i32, i32
  }
  func.func @transform_2(%arg0: i32) -> (i32, i32, i32) {
    %c0_i32 = arith.constant 0 : i32
    %c0_i32_0 = arith.constant 0 : i32
    %c0_i32_1 = arith.constant 0 : i32
    return %arg0, %c0_i32, %c0_i32_0 : i32, i32, i32
  }
  func.func @transform_3(%arg0: i32) -> (i32, i32, i32) {
    %c0_i32 = arith.constant 0 : i32
    %c0_i32_0 = arith.constant 0 : i32
    %c0_i32_1 = arith.constant 0 : i32
    return %arg0, %c0_i32, %c0_i32_0 : i32, i32, i32
  }
  func.func @transform_4(%arg0: i32) -> (i32, i32, i32) {
    %c0_i32 = arith.constant 0 : i32
    %c0_i32_0 = arith.constant 0 : i32
    %c0_i32_1 = arith.constant 0 : i32
    return %arg0, %c0_i32, %c0_i32_0 : i32, i32, i32
  }
  func.func @transform_5(%arg0: i32) -> (i32, i32, i32) {
    %c0_i32 = arith.constant 0 : i32
    %c0_i32_0 = arith.constant 0 : i32
    %c0_i32_1 = arith.constant 0 : i32
    return %arg0, %c0_i32, %c0_i32_0 : i32, i32, i32
  }
}

</mosaic_0001>

<bundles_post_ra>
// kernel: tpu_custom_call.1
= control target key start
LH: loop header
LB: loop body
LE: loop exit
PB: predicated region body
PF: predicated region fallthrough
CT: control target
= control target key end

     0   :  { %s1016_s0 = inlined_call_operand.vmem [shape: f32[2,8,32], index: 0, kind: input, shape index: {}]   ;;  %s1017_s1 = inlined_call_operand.hbm [shape: f32[2,8,8], index: 1, kind: input, shape index: {}]   ;;  %s1018_s2 = inlined_call_operand.vmem [shape: s32[2,8,1], index: 2, kind: input, shape index: {}]   ;;  %s1019_s3 = inlined_call_operand.hbm [shape: f32[2,8,8], index: 3, kind: input, shape index: {}]   ;;  %s1020_s4 = inlined_call_operand.vmem [shape: f32[2,1,8], index: 4, kind: input, shape index: {}]   ;;  %s1021_s5 = inlined_call_operand.hbm [shape: f32[2,1,128], index: 5, kind: output, shape index: {}]  }
   0x1   :  { %1022 = sst [smem:[#allocation12_spill]] %s1017_s1 }
   0x2   :  { %10 = vsyncpa [#allocation3], 0 }
   0x3   :  { %12 = vsyncpa [#allocation3 + $0x1], 0 }
   0x4   :  { %13 = vsyncpa [#allocation6], 0 }
   0x5   :  { %15 = vsyncpa [#allocation6 + $0x1], 0 }
   0x6   :  { %16 = vsyncpa [#allocation4], 0 }
   0x7   :  { %18 = vsyncpa [#allocation4 + $0x1], 0  ;;  %s821_s18 = smov 0   ;;  %s823_s19 = smov 0  }
   0x8   :  { %s825_s20 = smov 0   ;;  %s827_s21 = smov 0  }
   0x9 LB: > { %s842_s22 = sadd.s32 4294967295, %s784_s21   ;;  %s575_s23 = sadd.s32 4294967294, %s784_s21   ;;  %s784_s21 = sphi %s827_s21, %s1036_s21   ;;  %s780_s20 = sphi %s825_s20, %s1035_s20   ;;  %s776_s19 = sphi %s823_s19, %s1034_s19   ;;  %s772_s18 = sphi %s821_s18, %s1033_s18  }
   0xa   : > { %s846_s24 = sadd.s32 1, %s784_s21   ;;  %s57_s25 = sadd.s32 1, %s780_s20 }
   0xb   : > { %s54_s26 = ssub.s32 %s784_s21, %s846_s24  ;;  %p64_p0 = scmp.ne.s32.totalorder %s780_s20, %s776_s19 }
   0xc   : > { %p55_p1 = scmp.eq.s32.totalorder %s54_s26, 0  ;;  %p65_p2 = scmp.eq.s32.totalorder %s784_s21, 0 }
   0xd   : > { %p70_p3 = scmp.ne.s32.totalorder %s776_s19, %s772_s18  ;;  %p71_p4 = scmp.eq.s32.totalorder %s842_s22, 0 }
   0xe   : > { %s858_s27 = scalar_select %p55_p1, %s780_s20, %s57_s25  }
   0xf   : > { %p860_p5 = por %p65_p2, %p64_p0  ;;  %p864_p6 = por %p71_p4, %p70_p3 }
  0x10   : > { %1023 = sst [smem:[#allocation11_spill]] %s858_s27  ;;  %p172_p7 = scmp.eq.s32.totalorder %s842_s22, 1 }
  0x11   : > { %p178_p8 = scmp.eq.s32.totalorder %s575_s23, 1  ;;  %p607_p10 = scmp.lt.s32.totalorder %s784_s21, 2 }
  0x12   : > { %p871_p11 = por %p172_p7, %p64_p0  ;;  %s880_s7 = sand.u32 1, %s780_s20  }
  0x13   : > { %p875_p12 = por %p178_p8, %p70_p3  ;;  %s579_s8 = sshll.u32 %s784_s21, 3 }
  0x14   : > { %s578_s9 = sshll.u32 %s880_s7, 3  ;;  %s1028_s1 = sld [smem:[#allocation12_spill]] }
  0x15   : > { %s209_s14 = scalar_lea.vmem [#allocation2], %s578_s9  ;;  %p889_p13 = pnand %p607_p10, %p860_p5 }
  0x16   : > { %s217_s15 = sshll.u32 %s209_s14, 4  ;;  %p582_p0 = scmp.ge.s32.totalorder %s784_s21, 1  ;;  %s218_s15 = int_to_ptr.vmem [resolvable:$true] %s217_s15 }
  0x17   : > { %p254_p1 = scmp.lt.s32.totalorder %s784_s21, 3  ;;  %s206_s17 = scalar_lea.sflag [#allocation3], %s880_s7 }
  0x18   : > { %p658_p3 = pneg %p889_p13 }
  0x1a   : > { %s213_s12 = scalar_lea.hbm %s1028_s1, %s579_s8  ;;  %s661_s10 = scalar_lea.hbm %s1028_s1, 16 }
  0x1b   : > { %s215_s13 = sshll.u32 %s213_s12, 4  ;;  %s216_s13 = int_to_ptr.hbm [resolvable:$true] %s215_s13 }
  0x1c   : > { %s654_s23 = sshra.s32 %s216_s13, 4  ;;  %s655_s23 = int_to_ptr.hbm [resolvable:$true] %s654_s23 }
  0x1d   : > { %s656_s25 = scalar_lea.hbm %s655_s23, 8  ;;  %p662_p5 = scmp.lt.s32.totalorder %s655_s23, %s1028_s1 }
  0x1e   : > { %p657_p2 = scmp.ne.s32.totalorder %s655_s23, %s656_s25  ;;  %p663_p8 = scmp.lt.s32.totalorder %s661_s10, %s656_s25 }
  0x20   : > { %p659_p4 = pnand %p658_p3, %p657_p2  ;;  %p664_p10 = por %p663_p8, %p662_p5 }
  0x22   : > { %p660_p7 = pneg %p659_p4 }
  0x24   : > { %p665_p9 = pnand %p664_p10, %p660_p7 }
  0x26   : > { %668 = shalt.err (!%p665_p9)
}
  0x27   : > { %599 = dma.hbm_to_vmem [thread:$0]  (!%p889_p13), %s216_s13, 128, %s218_s15, %s206_s17  }
  0x28   : > { %p913_p2 = pnand %p582_p0, %p254_p1  ;;  %s239_s23 = scalar_lea.hbm %s1019_s3, %s579_s8 }
  0x29   : > { %s241_s25 = sshll.u32 %s239_s23, 4  ;;  %s235_s10 = scalar_lea.vmem [#allocation5], %s578_s9  ;;  %s242_s25 = int_to_ptr.hbm [resolvable:$true] %s241_s25 }
  0x2a   : > { %s243_s11 = sshll.u32 %s235_s10, 4  ;;  %s232_s12 = scalar_lea.sflag [#allocation6], %s880_s7  ;;  %s244_s11 = int_to_ptr.vmem [resolvable:$true] %s243_s11 }
  0x2b   : > { %s684_s1 = sshra.s32 %s242_s25, 4  ;;  %s691_s17 = scalar_lea.hbm %s1019_s3, 16  ;;  %s685_s1 = int_to_ptr.hbm [resolvable:$true] %s684_s1 }
  0x2c   : > { %s686_s27 = scalar_lea.hbm %s685_s1, 8  ;;  %p692_p4 = scmp.lt.s32.totalorder %s685_s1, %s1019_s3 }
  0x2d   : > { %p687_p9 = scmp.ne.s32.totalorder %s685_s1, %s686_s27  ;;  %p693_p7 = scmp.lt.s32.totalorder %s691_s17, %s686_s27 }
  0x2f   : > { %p689_p0 = pnand %p687_p9, %p658_p3  ;;  %p694_p5 = por %p693_p7, %p692_p4 }
  0x31   : > { %p690_p1 = pneg %p689_p0 }
  0x33   : > { %p695_p8 = pnand %p694_p5, %p690_p1 }
  0x35   : > { %698 = shalt.err (!%p695_p8)
}
  0x36   : > { %602 = dma.hbm_to_vmem [thread:$0]  (!%p889_p13), %s242_s25, 128, %s244_s11, %s232_s12  }
  0x37   : > { %258 = sbr.rel (%p913_p2) target bundleno = 671 (0x29f), region = 40  ;;  %s935_s7 = sand.u32 (!%p913_p2), 1, %s776_s19  }
  0x38   : > { %s583_s9 = sshll.u32 (!%p913_p2), %s935_s7, 3  ;;  %s261_s28 = scalar_lea.sflag (!%p913_p2), [#allocation3], %s935_s7 }
  0x39   : > { %s939_s23 = scalar_lea.vmem (!%p913_p2), [#allocation2], %s583_s9 }
  0x3c   : > { %759 = dma.done.wait (%p864_p6), %s261_s28, 128  }
  0x3d   : > { %761 = vsyncadd (%p864_p6), %s261_s28, 4294967168  ;;  %s271_s1 = scalar_lea.sflag [#allocation6], %s935_s7  ;;  %s946_s27 = scalar_lea.vmem [#allocation5], %s583_s9 }
  0x3e   : > { %763 = dma.done.wait (%p864_p6), %s271_s1, 128  }
  0x3f   : > { %765 = vsyncadd (%p864_p6), %s271_s1, 4294967168  ;;  %p317_p13 = scmp.lt.s32.totalorder %s842_s22, 1  ;;  %v330_v0 = vlaneseq  ;;  %vm336_vm1 = vcmask 261120   ;;  %v786_v5 = vmov 31   ;;  %v787_v7 = vmov 0   ;;  %s790_s8 = smov 97  }
  0x40   : > { %646 = vset.pattern.permute.xlu0 %v786_v5  ;;  %647 = vset.pattern.permute.xlu1 %v787_v7  ;;  %vm389_vm2 = vcmask 261368   ;;  %v788_v10 = vmov 0.0   ;;  %vm374_vm6 = vcmask 7168   ;;  %v789_v25 = vmov 1.0   ;;  %v397_v42 = vld [vmem:[%s939_s23] sm:$0xff]  ;;  %v398_v43 = vld [vmem:[%s946_s27] sm:$0xff]  ;;  %s449_s23 = scalar_lea.hbm %s1021_s5, %s842_s22 }
  0x41   : > { %s954_s16 = scalar_select %p317_p13, %s842_s22, 1  ;;  %v956_v1 = vand.u32 127, %v330_v0  ;;  %v400_v44 = vsub.f32 %v397_v42, %v398_v43  ;;  %vm406_vm7 = vcmask 64512  }
  0x42   : > { %s316_s1 = scalar_lea.vmem [#allocation7], %s935_s7  ;;  %s734_s29 = scalar_lea.hbm %s1021_s5, 2 }
  0x43   : > { %s585_s14 = sshll.u32 %s954_s16, 3  ;;  %vm332_vm0 = vcmp.lt.s32.totalorder %v956_v1, 31  ;;  %s327_s26 = scalar_lea.vmem %s1020_s4, %s954_s16  ;;  %v401_v45 = vand.u32 2147483647, %v400_v44  ;;  %vm419_vm8 = vcmp.eq.s32.totalorder %v956_v1, 3  ;;  %vm418_vm9 = vcmp.eq.s32.totalorder %v956_v1, 2 }
  0x44   : > { %s320_s11 = scalar_lea.vmem %s1016_s0, %s585_s14  ;;  %s324_s13 = scalar_lea.vmem %s1018_s2, %s585_s14  ;;  %v649_v46 = vld [vmem:[%s327_s26] ss:$0 sm:$0xff]  ;;  %vm417_vm10 = vcmp.eq.s32.totalorder %v956_v1, 1  ;;  %vm416_vm11 = vcmp.eq.s32.totalorder %v956_v1, 0 }
  0x45   : > { %v328_v2 = vld [vmem:[%s320_s11] sm:$0xff]  ;;  %v405_v47 = vmul.f32 %v649_v46, %v401_v45  ;;  %s451_s27 = sshll.u32 %s316_s1, 4  ;;  %s453_s16 = sshll.u32 %s449_s23, 4  ;;  %s452_s27 = int_to_ptr.vmem [resolvable:$true] %s451_s27  ;;  %s454_s16 = int_to_ptr.hbm [resolvable:$true] %s453_s16 }
  0x46   : > { %v335_v3 = vsel %vm332_vm0, %v328_v2, -inf  ;;  %v329_v6 = vld [vmem:[%s324_s13] sm:$0xff]  ;;  %s441_s14 = scalar_lea.sflag [#allocation4], %s935_s7  ;;  %s728_s25 = sshra.s32 %s454_s16, 4  ;;  %s729_s25 = int_to_ptr.hbm [resolvable:$true] %s728_s25 }
  0x47   : > { %v337_v4 = vsel %vm336_vm1, %v335_v3, -inf  ;;  %356 = vperm.xlu1 %647, %v329_v6   ;;  %vm363_vm5 = vcmp.eq.s32.totalorder %v329_v6, 31  ;;  %v407_v48 = vsel %vm406_vm7, %v405_v47, 0.0  ;;  %s730_s22 = scalar_lea.hbm %s729_s25, 1  ;;  %p735_p2 = scmp.lt.s32.totalorder %s729_s25, %s1021_s5 }
  0x48   : > { %338 = vmax.xlane.f32.xlu0 %v337_v4  ;;  %v364_v26 = vsel %vm363_vm5, 0.1, %v789_v25  ;;  %p731_p6 = scmp.ne.s32.totalorder %s729_s25, %s730_s22  ;;  %p736_p9 = scmp.lt.s32.totalorder %s734_s29, %s730_s22 }
  0x49   : > { %v382_v28 = vsel %vm374_vm6, %v364_v26, 0.0 }
  0x4a   : > { %v383_v30 = vrot.slane %v382_v28, 4  ;;  %p732_p3 = pnand %p731_p6, %p871_p11  ;;  %p737_p0 = por %p736_p9, %p735_p2 }
  0x4c   : > { %v384_v31 = vadd.f32 %v383_v30, %v382_v28  ;;  %p733_p10 = pneg %p732_p3 }
  0x4e   : > { %v385_v32 = vrot.slane %v384_v31, 2  ;;  %p738_p1 = pnand %p737_p0, %p733_p10 }
  0x50   : > { %v386_v33 = vadd.f32 %v385_v32, %v384_v31 }
  0x52   : > { %v387_v34 = vrot.slane %v386_v33, 1 }
  0x54   : > { %v388_v35 = vadd.f32 %v387_v34, %v386_v33 }
  0xb9   : > { %v357_v19 = vpop.permute.xlu1 %356 }
  0xba   : > { %vm358_vm4 = vcmp.eq.s32.totalorder %v956_v1, %v357_v19 }
  0xbb   : > { %v339_v8 = vpop.xlane.xlu0 %338  ;;  %v359_v20 = vsel %vm358_vm4, %v328_v2, 0.0 }
  0xbc   : > { %v340_v9 = vmax.f32 %v339_v8, %v328_v2  ;;  %vm365_vm3 = vcmp.ge.f32.partialorder %v339_v8, %v328_v2  ;;  %v360_v21 = vsel %vm336_vm1, %v359_v20, 0.0 }
  0xbd   : > { %v587_v11 = vsel %vm365_vm3, 1.0, %v788_v10  ;;  %361 = vadd.xlane.f32.xlu2 %v360_v21 }
  0xbe   : > { %v390_v12 = vsel %vm389_vm2, %v587_v11, 0.0  ;;  %343 = vperm.xlu0 %646, %v340_v9  }
  0xbf   : > { %v391_v13 = vrot.slane %v390_v12, 4 }
  0xc1   : > { %v392_v14 = vadd.f32 %v391_v13, %v390_v12 }
  0xc3   : > { %v393_v15 = vrot.slane %v392_v14, 2 }
  0xc5   : > { %v394_v16 = vadd.f32 %v393_v15, %v392_v14 }
  0xc7   : > { %v395_v17 = vrot.slane %v394_v16, 1 }
  0xc9   : > { %v396_v18 = vadd.f32 %v395_v17, %v394_v16 }
  0xcb   : > { %422 = vperm.xlu0 %646, %v396_v18  }
  0xd3   : > { %648 = vset.pattern.permute.xlu0 %v787_v7 }
 0x130   : > { %v344_v22 = vpop.permute.xlu0 %343  ;;  %v362_v39 = vpop.xlane.xlu2 %361 }
 0x131   : > { %v346_v23 = vsub.f32 %v328_v2, %v344_v22 }
 0x133   : > { %v347_v24 = vmul.f32 1.442695, %v346_v23 }
 0x135   : > { %650 = vpow2.f32 %v347_v24 }
 0x13b   : > { %v651_v27 = vpop.eup %650 }
 0x13c   : > { %v349_v29 = vsel %vm336_vm1, %v651_v27, 0.0 }
 0x13d   : > { %350 = vadd.xlane.f32.xlu1 %v349_v29  ;;  %v423_v0 = vpop.permute.xlu0 %422 }
 0x13e   : > { %v425_v3 = vsel %vm419_vm8, %v423_v0, 0.0 }
 0x156   : > { %429 = vperm.xlu1 %647, %v388_v35  }
 0x1b0   : > { %v351_v36 = vpop.xlane.xlu1 %350 }
 0x1b1   : > { %652 = vlog2.f32 %v351_v36 }
 0x1b7   : > { %v653_v37 = vpop.eup %652 }
 0x1b8   : > { %v353_v38 = vmul.f32 0.6931472, %v653_v37 }
 0x1ba   : > { %v354_v40 = vadd.f32 %v353_v38, %v340_v9 }
 0x1bc   : > { %v368_v41 = vsub.f32 %v354_v40, %v362_v39 }
 0x1be   : > { %370 = vrot.lane.b32.xlu2 %v368_v41, %s790_s8 }
 0x1c8   : > { %v430_v5 = vpop.permute.xlu1 %429 }
 0x1e7   : > { %408 = vadd.xlane.f32.xlu2 %v407_v48 }
 0x218   : > { %v371_v49 = vpop.permute.xlu2 %370 }
 0x219   : > { %v373_v50 = vmul.f32 %v371_v49, %v364_v26 }
 0x21b   : > { %v375_v51 = vsel %vm374_vm6, %v373_v50, 0.0 }
 0x21c   : > { %v376_v52 = vrot.slane %v375_v51, 4 }
 0x21e   : > { %v377_v53 = vadd.f32 %v376_v52, %v375_v51 }
 0x220   : > { %v378_v54 = vrot.slane %v377_v53, 2 }
 0x222   : > { %v379_v55 = vadd.f32 %v378_v54, %v377_v53 }
 0x224   : > { %v380_v56 = vrot.slane %v379_v55, 1 }
 0x226   : > { %v381_v57 = vadd.f32 %v380_v56, %v379_v55 }
 0x228   : > { %435 = vperm.xlu0 %648, %v381_v57  }
 0x25a   : > { %v409_v58 = vpop.xlane.xlu2 %408 }
 0x25b   : > { %v410_v59 = vrot.slane %v409_v58, 4 }
 0x25d   : > { %v411_v60 = vadd.f32 %v410_v59, %v409_v58 }
 0x25f   : > { %v412_v61 = vrot.slane %v411_v60, 2 }
 0x261   : > { %v413_v62 = vadd.f32 %v412_v61, %v411_v60 }
 0x263   : > { %v414_v63 = vrot.slane %v413_v62, 1 }
 0x265   : > { %v415_v2 = vadd.f32 %v414_v63, %v413_v62 }
 0x267   : > { %v426_v4 = vsel %vm418_vm9, %v415_v2, %v425_v3 }
 0x268   : > { %v432_v6 = vsel %vm417_vm10, %v430_v5, %v426_v4 }
 0x29a   : > { %v436_v7 = vpop.permute.xlu0 %435 }
 0x29b   : > { %v438_v8 = vsel %vm416_vm11, %v436_v7, %v432_v6 }
 0x29c   : > { %439 = vst [vmem:[%s316_s1] sm:$0x1] %v438_v8 }
 0x29d   : > { %741 = shalt.err (!%p738_p1)
}
 0x29e   : > { %594 = dma.vmem_to_hbm [thread:$0]  (%p871_p11), %s452_s27, 16, %s454_s16, %s441_s14  }
 0x29f PF: > { %s465_s7 = sand.u32 1, %s772_s18   ;;  %p1031_p4 = scmp.ge.s32.totalorder %s784_s21, 2 }
 0x2a0   : > { %s466_s15 = scalar_lea.sflag [#allocation4], %s465_s7 }
 0x2a1   : > { %p604_p7 = pnand %p1031_p4, %p875_p12 }
 0x2a3   : > { %p605_p5 = pneg %p604_p7 }
 0x2a5   : > { %767 = dma.done.wait (%p605_p5), %s466_s15, 16  }
 0x2a6   : > { %769 = vsyncadd (%p605_p5), %s466_s15, 4294967280  ;;  %s1032_s17 = sld [smem:[#allocation11_spill]]  ;;  %p21_p8 = scmp.ge.s32.totalorder %s846_s24, 4  }
 0x2a7   : > { %s1033_s18 = smov %s776_s19  ;;  %s1034_s19 = smov %s780_s20 }
 0x2a8   : > { %s1036_s21 = smov %s846_s24  ;;  %23 = sbr.rel (!%p21_p8) target bundleno = 9 (0x9), region = 107 }
 0x2ac   : > { %s1035_s20 = smov %s1032_s17 }
 0x2ad   :  { %471 = vsyncpa [#allocation3], 1 }
 0x2ae   :  { %473 = vsyncpa [#allocation3 + $0x1], 1 }
 0x2af   :  { %474 = vsyncpa [#allocation6], 1 }
 0x2b0   :  { %476 = vsyncpa [#allocation6 + $0x1], 1 }
 0x2b1   :  { %477 = vsyncpa [#allocation4], 1 }
 0x2b2   :  { %479 = vsyncpa [#allocation4 + $0x1], 1 }

</bundles_post_ra>
